<compile_context>
chip_gen: v5e
topology: v5e:2x2
jax: 0.10.0
libtpu: 0.0.40
codegen_flags: <defaults>
</compile_context>

<pallas_src>
import functools

import jax
import jax.numpy as jnp
from jax import lax
from jax.experimental import pallas as pl
from jax.experimental.pallas import tpu as pltpu


def _mse_kernel(pred_ref, label_ref, out_ref, acc_ref, *,
                inv_n, n_true, tn, nk_per_split, needs_mask):
    # pred_ref/label_ref: (TB, TN) tile; out_ref/acc_ref: (TB, 1) f32.
    k = pl.program_id(2)

    @pl.when(k == 0)
    def _():
        acc_ref[...] = jnp.zeros_like(acc_ref)

    diff = pred_ref[...].astype(jnp.float32) - label_ref[...].astype(jnp.float32)
    sq = diff * diff

    if needs_mask:
        # Zero lanes whose *global* column index is >= n_true.  Uses the
        # un-clamped chunk index, so a redundant (clamped) chunk on the second
        # N-split contributes exactly zero as well.
        s = pl.program_id(0)
        k_global = s * nk_per_split + k
        col = lax.broadcasted_iota(jnp.int32, sq.shape, 1) + k_global * tn
        sq = jnp.where(col < n_true, sq, 0.0)

    acc_ref[...] += jnp.sum(sq, axis=-1, keepdims=True)

    @pl.when(k == pl.num_programs(2) - 1)
    def _():
        out_ref[...] = acc_ref[...] * inv_n


def _round_up(x, m):
    return ((x + m - 1) // m) * m


def _choose_tiles(b, n, itemsize):
    """Pick (tb, tn): ~1M elements per input per grid step, (sublane,128) aligned."""
    sub = {4: 8, 2: 16, 1: 32}.get(itemsize, 8)   # sublane count for this dtype
    lane_n = _round_up(n, 128)
    max_elems = 1 << 20                            # ~4 MiB f32 / 2 MiB bf16 per input block
    if lane_n * sub <= max_elems:
        # Whole (lane-padded) row fits: take the full row and grow the row count.
        tn = lane_n
        rows = max(sub, (max_elems // tn) // sub * sub)
        tb = min(_round_up(b, sub), rows, 512)
    else:
        # Long rows: minimum sublane rows, wide lane-aligned reduction chunks.
        tb = sub
        tn = max(128, (max_elems // sub) // 128 * 128)
    return tb, tn


def mse_loss(pred, label):
    """mean((pred - label)**2) over all dims except dim 0. Returns (B,) f32."""
    pred = jnp.asarray(pred)
    label = jnp.reshape(jnp.asarray(label), pred.shape)  # torch's label.view(pred.size())

    b = pred.shape[0]
    n = 1
    for d in pred.shape[1:]:
        n *= d

    pred2d = pred.reshape(b, n)
    label2d = label.reshape(b, n)

    itemsize = jnp.dtype(pred2d.dtype).itemsize
    tb, tn = _choose_tiles(b, n, itemsize)

    nb_rows = pl.cdiv(b, tb)
    nk_total = pl.cdiv(n, tn)
    # Guarantee >= 2 steps on a parallel axis for v7x's two TensorCores: if the
    # batch axis yields a single block, split the reduction into two halves.
    n_splits = 2 if (nb_rows == 1 and nk_total >= 2) else 1
    nk_per_split = pl.cdiv(nk_total, n_splits)
    # Mask needed for a ragged N tail or for the redundant (clamped) chunk that
    # appears when nk_total is odd and the reduction is split in two.
    needs_mask = (n % tn != 0) or (n_splits * nk_per_split != nk_total)

    kernel = functools.partial(
        _mse_kernel,
        inv_n=1.0 / float(n),
        n_true=n,
        tn=tn,
        nk_per_split=nk_per_split,
        needs_mask=needs_mask,
    )

    def in_map(s, i, k):
        # Clamp so the second split never requests a fully out-of-range block;
        # the in-kernel mask (computed from the un-clamped index) zeroes it.
        return (i, jnp.minimum(s * nk_per_split + k, nk_total - 1))

    out = pl.pallas_call(
        kernel,
        out_shape=jax.ShapeDtypeStruct((n_splits, b, 1), jnp.float32),
        grid_spec=pltpu.PrefetchScalarGridSpec(
            num_scalar_prefetch=0,
            grid=(n_splits, nb_rows, nk_per_split),
            in_specs=[
                pl.BlockSpec((tb, tn), in_map),
                pl.BlockSpec((tb, tn), in_map),
            ],
            out_specs=pl.BlockSpec((None, tb, 1), lambda s, i, k: (s, i, 0)),
            scratch_shapes=[pltpu.VMEM((tb, 1), jnp.float32)],
        ),
        compiler_params=pltpu.CompilerParams(
            dimension_semantics=("parallel", "parallel", "arbitrary"),
            vmem_limit_bytes=48 * 1024 * 1024,
        ),
        cost_estimate=pl.CostEstimate(
            flops=3 * b * n,
            transcendentals=0,
            bytes_accessed=2 * b * n * itemsize + 4 * b,
        ),
    )(pred2d, label2d)

    # Each split's partial sum is already scaled by 1/n, so adding them is the
    # full per-row mean.  (n_splits is 1 or 2; this is a trivially small op.)
    return jnp.sum(out, axis=0)[:, 0]


if __name__ == "__main__":
    key = jax.random.PRNGKey(0)
    k1, k2 = jax.random.split(key)

    # Small shapes consistent with an image-reconstruction loss: NCHW.
    B, C, H, W = 2, 4, 16, 16
    pred = jax.random.normal(k1, (B, C, H, W), dtype=jnp.float32)
    # Label supplied flattened to exercise the .view(pred.size()) semantics.
    label = jax.random.normal(k2, (B, C * H * W), dtype=jnp.float32)

    loss = jax.block_until_ready(mse_loss(pred, label))

    ref = jnp.mean((pred - label.reshape(pred.shape)) ** 2, axis=(1, 2, 3))
    assert loss.shape == (B,)
    assert jnp.allclose(loss, ref, atol=1e-5, rtol=1e-5)

    # Non-aligned bf16 case: exercises the in-kernel ragged-tail mask.
    k3, k4 = jax.random.split(k1)
    pred_b = jax.random.normal(k3, (3, 3, 10, 13), dtype=jnp.bfloat16)
    label_b = jax.random.normal(k4, (3, 3, 10, 13), dtype=jnp.bfloat16)
    loss_b = jax.block_until_ready(mse_loss(pred_b, label_b))
    ref_b = jnp.mean(
        (pred_b.astype(jnp.float32) - label_b.astype(jnp.float32)) ** 2,
        axis=(1, 2, 3),
    )
    assert loss_b.shape == (3,)
    assert jnp.allclose(loss_b, ref_b, atol=1e-3, rtol=1e-3)

    print("KERNEL_OK")
</pallas_src>

<mosaic_0001>
module attributes {stable_mosaic.version = 11 : i64} {
  func.func @_mse_kernel(%arg0: i32, %arg1: i32, %arg2: i32, %arg3: memref<8x1024xf32, #tpu.memory_space<vmem>>, %arg4: memref<8x1024xf32, #tpu.memory_space<vmem>>, %arg5: memref<1x8x1xf32, #tpu.memory_space<vmem>>, %arg6: memref<8x1xf32, #tpu.memory_space<vmem>>) attributes {dimension_semantics = [#tpu.dimension_semantics<parallel>, #tpu.dimension_semantics<parallel>, #tpu.dimension_semantics<arbitrary>], iteration_bounds = array<i64: 1, 1, 1>, scalar_prefetch = 0 : i64, scratch_operands = 1 : i64, tpu.core_type = #tpu.core_type<tc>, window_params = [{transform_indices = @transform_0, window_bounds = array<i64: 8, 1024>}, {transform_indices = @transform_1, window_bounds = array<i64: 8, 1024>}, {transform_indices = @transform_2, window_bounds = array<i64: 1, 8, 1>}]} {
    %c0_i32 = arith.constant 0 : i32
    %0 = arith.cmpi eq, %arg2, %c0_i32 : i32
    %1 = arith.extui %0 : i1 to i32
    %c0_i32_0 = arith.constant 0 : i32
    %2 = arith.cmpi ne, %1, %c0_i32_0 : i32
    scf.if %2 {
      %cst_10 = arith.constant 0.000000e+00 : f32
      %15 = vector.broadcast %cst_10 : f32 to vector<8x1xf32>
      %c0_11 = arith.constant 0 : index
      %c0_12 = arith.constant 0 : index
      %16 = vector.load %arg6[%c0_11, %c0_12] : memref<8x1xf32, #tpu.memory_space<vmem>>, vector<8x1xf32>
      tpu.vector_store %arg6[%c0_11, %c0_12], %15 {strides = array<i32>} : memref<8x1xf32, #tpu.memory_space<vmem>>, vector<8x1xf32>,
    } else {
    }
    %c0 = arith.constant 0 : index
    %c0_1 = arith.constant 0 : index
    %3 = vector.load %arg3[%c0, %c0_1] : memref<8x1024xf32, #tpu.memory_space<vmem>>, vector<8x1024xf32>
    %c0_2 = arith.constant 0 : index
    %c0_3 = arith.constant 0 : index
    %4 = vector.load %arg4[%c0_2, %c0_3] : memref<8x1024xf32, #tpu.memory_space<vmem>>, vector<8x1024xf32>
    %5 = arith.subf %3, %4 : vector<8x1024xf32>
    %6 = arith.mulf %5, %5 : vector<8x1024xf32>
    %c0_4 = arith.constant 0 : index
    %c0_5 = arith.constant 0 : index
    %7 = vector.load %arg6[%c0_4, %c0_5] : memref<8x1xf32, #tpu.memory_space<vmem>>, vector<8x1xf32>
    %cst = arith.constant dense<0.000000e+00> : vector<8xf32>
    %8 = vector.multi_reduction <add>, %6, %cst [1] : vector<8x1024xf32> to vector<8xf32>
    %9 = vector.shape_cast %8 : vector<8xf32> to vector<8x1xf32>
    %10 = arith.addf %7, %9 : vector<8x1xf32>
    %c0_6 = arith.constant 0 : index
    %c0_7 = arith.constant 0 : index
    %11 = vector.load %arg6[%c0_6, %c0_7] : memref<8x1xf32, #tpu.memory_space<vmem>>, vector<8x1xf32>
    tpu.vector_store %arg6[%c0_6, %c0_7], %10 {strides = array<i32>} : memref<8x1xf32, #tpu.memory_space<vmem>>, vector<8x1xf32>,
    %c0_i32_8 = arith.constant 0 : i32
    %12 = arith.cmpi eq, %arg2, %c0_i32_8 : i32
    %13 = arith.extui %12 : i1 to i32
    %c0_i32_9 = arith.constant 0 : i32
    %14 = arith.cmpi ne, %13, %c0_i32_9 : i32
    scf.if %14 {
      %c0_10 = arith.constant 0 : index
      %c0_11 = arith.constant 0 : index
      %15 = vector.load %arg6[%c0_10, %c0_11] : memref<8x1xf32, #tpu.memory_space<vmem>>, vector<8x1xf32>
      %cst_12 = arith.constant 9.765625E-4 : f32
      %16 = vector.broadcast %cst_12 : f32 to vector<8x1xf32>
      %17 = arith.mulf %15, %16 : vector<8x1xf32>
      %c0_13 = arith.constant 0 : index
      %c0_14 = arith.constant 0 : index
      %c0_15 = arith.constant 0 : index
      %18 = vector.load %arg5[%c0_13, %c0_14, %c0_15] : memref<1x8x1xf32, #tpu.memory_space<vmem>>, vector<1x8x1xf32>
      %19 = vector.shape_cast %18 : vector<1x8x1xf32> to vector<8x1xf32>
      %20 = vector.shape_cast %17 : vector<8x1xf32> to vector<1x8x1xf32>
      tpu.vector_store %arg5[%c0_13, %c0_14, %c0_15], %20 {strides = array<i32>} : memref<1x8x1xf32, #tpu.memory_space<vmem>>, vector<1x8x1xf32>,
    } else {
    }
    return
  }
  func.func @transform_0(%arg0: i32, %arg1: i32, %arg2: i32) -> (i32, i32) {
    %c1_i32 = arith.constant 1 : i32
    %0 = arith.muli %arg0, %c1_i32 : i32
    %1 = arith.addi %0, %arg2 : i32
    %c0_i32 = arith.constant 0 : i32
    %2 = arith.minsi %1, %c0_i32 : i32
    %c0_i32_0 = arith.constant 0 : i32
    return %arg1, %2 : i32, i32
  }
  func.func @transform_1(%arg0: i32, %arg1: i32, %arg2: i32) -> (i32, i32) {
    %c1_i32 = arith.constant 1 : i32
    %0 = arith.muli %arg0, %c1_i32 : i32
    %1 = arith.addi %0, %arg2 : i32
    %c0_i32 = arith.constant 0 : i32
    %2 = arith.minsi %1, %c0_i32 : i32
    %c0_i32_0 = arith.constant 0 : i32
    return %arg1, %2 : i32, i32
  }
  func.func @transform_2(%arg0: i32, %arg1: i32, %arg2: i32) -> (i32, i32, i32) {
    %c0_i32 = arith.constant 0 : i32
    %c0_i32_0 = arith.constant 0 : i32
    return %arg0, %arg1, %c0_i32 : i32, i32, i32
  }
}

</mosaic_0001>

<bundles_post_ra>
// kernel: tpu_custom_call.1
= control target key start
LH: loop header
LB: loop body
LE: loop exit
PB: predicated region body
PF: predicated region fallthrough
CT: control target
= control target key end

     0   :  { %7 = vsyncpa [#allocation4], 0  ;;  %s295_s0 = inlined_call_operand.hbm [shape: f32[2,1024], index: 0, kind: input, shape index: {}]   ;;  %s296_s1 = inlined_call_operand.hbm [shape: f32[2,1024], index: 1, kind: input, shape index: {}]   ;;  %s297_s2 = inlined_call_operand.vmem [shape: f32[1,2,1], index: 2, kind: output, shape index: {}]  }
   0x1   :  { %8 = vsyncpa [#allocation6], 0 }
   0x2   :  { %16 = vsyncadd [#allocation4], 768  ;;  %s19_s11 = sshll.u32 %s295_s0, 4  ;;  %s263_s12 = smov [#allocation3]   ;;  %s20_s11 = int_to_ptr.hbm [resolvable:$true] %s19_s11 }
   0x3   :  { %s21_s13 = sshll.u32 %s263_s12, 4  ;;  %s264_s14 = smov 256   ;;  %s22_s13 = int_to_ptr.vmem [resolvable:$true] %s21_s13 }
   0x4   :  { %s265_s15 = smov 16  }
   0x5   :  { %27 = dma.hbm_to_vmem [thread:$0]  %s20_s11, 256, %s22_s13, [#allocation4], %s264_s14, %s264_s14, %s265_s15  }
   0x6   :  { %35 = vsyncadd [#allocation6], 768  ;;  %s38_s18 = sshll.u32 %s296_s1, 4  ;;  %s266_s19 = smov [#allocation5]   ;;  %s39_s18 = int_to_ptr.hbm [resolvable:$true] %s38_s18 }
   0x7   :  { %s40_s20 = sshll.u32 %s266_s19, 4  ;;  %s41_s20 = int_to_ptr.vmem [resolvable:$true] %s40_s20 }
   0x8   :  { %46 = dma.hbm_to_vmem [thread:$0]  %s39_s18, 256, %s41_s20, [#allocation6], %s264_s14, %s264_s14, %s265_s15  }
   0x9   :  { %259 = dma.done.wait [#allocation4], 1024  }
   0xa   :  { %260 = vsyncadd [#allocation4], 4294966272 }
   0xb   :  { %261 = dma.done.wait [#allocation6], 1024  }
   0xc   :  { %262 = vsyncadd [#allocation6], 4294966272  ;;  %v69_v0 = vld [vmem:[#allocation3] sm:$0xff]  ;;  %v70_v1 = vld [vmem:[#allocation3 + $0x8] sm:$0xff]  ;;  %vm67_vm0 = vcmask 7168   ;;  %v267_v6 = vmov 0.0  }
   0xd   :  { %v71_v2 = vld [vmem:[#allocation3 + $0x10] sm:$0xff]  ;;  %v72_v3 = vld [vmem:[#allocation3 + $0x18] sm:$0xff]  ;;  %v73_v4 = vld [vmem:[#allocation3 + $0x20] sm:$0xff]  ;;  %68 = vst.msk [vmem:[#allocation2] sm:$0xff] %vm67_vm0, %v267_v6 }
   0xe   :  { %v74_v5 = vld [vmem:[#allocation3 + $0x28] sm:$0xff]  ;;  %v75_v7 = vld [vmem:[#allocation3 + $0x30] sm:$0xff]  ;;  %v76_v8 = vld [vmem:[#allocation3 + $0x38] sm:$0xff] }
   0xf   :  { %v77_v9 = vld [vmem:[#allocation5] sm:$0xff]  ;;  %v78_v10 = vld [vmem:[#allocation5 + $0x8] sm:$0xff]  ;;  %v79_v11 = vld [vmem:[#allocation5 + $0x10] sm:$0xff] }
  0x10   :  { %v80_v12 = vld [vmem:[#allocation5 + $0x18] sm:$0xff]  ;;  %v85_v13 = vsub.f32 %v69_v0, %v77_v9  ;;  %v81_v14 = vld [vmem:[#allocation5 + $0x20] sm:$0xff]  ;;  %v82_v15 = vld [vmem:[#allocation5 + $0x28] sm:$0xff]  ;;  %v86_v17 = vsub.f32 %v70_v1, %v78_v10  ;;  %v87_v18 = vsub.f32 %v71_v2, %v79_v11 }
  0x11   :  { %v83_v16 = vld [vmem:[#allocation5 + $0x30] sm:$0xff]  ;;  %v88_v19 = vsub.f32 %v72_v3, %v80_v12  ;;  %v84_v20 = vld [vmem:[#allocation5 + $0x38] sm:$0xff]  ;;  %v89_v21 = vsub.f32 %v73_v4, %v81_v14  ;;  %v90_v22 = vsub.f32 %v74_v5, %v82_v15 }
  0x12   :  { %v91_v23 = vsub.f32 %v75_v7, %v83_v16  ;;  %v93_v24 = vmul.f32 %v85_v13, %v85_v13  ;;  %v92_v25 = vsub.f32 %v76_v8, %v84_v20  ;;  %v95_v26 = vmul.f32 %v87_v18, %v87_v18 }
  0x13   :  { %v94_v27 = vmul.f32 %v86_v17, %v86_v17  ;;  %v97_v28 = vmul.f32 %v89_v21, %v89_v21  ;;  %v96_v30 = vmul.f32 %v88_v19, %v88_v19  ;;  %v98_v31 = vmul.f32 %v90_v22, %v90_v22 }
  0x14   :  { %v99_v29 = vmul.f32 %v91_v23, %v91_v23  ;;  %110 = vst [vmem:[#allocation1] ss:$4 sm:$0xff] %v93_v24  ;;  %v100_v32 = vmul.f32 %v92_v25, %v92_v25  ;;  %v101_v48 = vld [vmem:[#allocation2] sm:$0xff] }
  0x15   :  { %112 = vst [vmem:[#allocation1 + $0x1] ss:$4 sm:$0xff] %v95_v26 }
  0x16   :  { %114 = vst [vmem:[#allocation1 + $0x2] ss:$4 sm:$0xff] %v97_v28 }
  0x17   :  { %116 = vst [vmem:[#allocation1 + $0x3] ss:$4 sm:$0xff] %v99_v29 }
  0x18   :  { %118 = vst [vmem:[#allocation1 + $0x20] ss:$4 sm:$0xff] %v94_v27 }
  0x19   :  { %120 = vst [vmem:[#allocation1 + $0x21] ss:$4 sm:$0xff] %v96_v30 }
  0x1a   :  { %122 = vst [vmem:[#allocation1 + $0x22] ss:$4 sm:$0xff] %v98_v31 }
  0x1b   :  { %124 = vst [vmem:[#allocation1 + $0x23] ss:$4 sm:$0xff] %v100_v32 }
  0x1e   :  { %v125_v33 = vld.sshfl [vmem:[#allocation1] sm:$0xff pattern:$0x73625140]  ;;  %v126_v34 = vld.sshfl [vmem:[#allocation1 + $0x8] sm:$0xff pattern:$0x73625140] }
  0x1f   :  { %v127_v35 = vld.sshfl [vmem:[#allocation1 + $0x10] sm:$0xff pattern:$0x73625140]  ;;  %v141_v36 = vadd.f32 %v126_v34, %v125_v33  ;;  %v128_v37 = vld.sshfl [vmem:[#allocation1 + $0x18] sm:$0xff pattern:$0x73625140] }
  0x21   :  { %v142_v38 = vadd.f32 %v141_v36, %v127_v35 }
  0x22   :  { %v129_v39 = vld.sshfl [vmem:[#allocation1 + $0x20] sm:$0xff pattern:$0x73625140]  ;;  %v130_v41 = vld.sshfl [vmem:[#allocation1 + $0x28] sm:$0xff pattern:$0x73625140] }
  0x23   :  { %v143_v40 = vadd.f32 %v142_v38, %v128_v37  ;;  %v131_v43 = vld.sshfl [vmem:[#allocation1 + $0x30] sm:$0xff pattern:$0x73625140]  ;;  %v132_v45 = vld.sshfl [vmem:[#allocation1 + $0x38] sm:$0xff pattern:$0x73625140] }
  0x25   :  { %v144_v42 = vadd.f32 %v143_v40, %v129_v39 }
  0x27   :  { %v145_v44 = vadd.f32 %v144_v42, %v130_v41 }
  0x29   :  { %v146_v46 = vadd.f32 %v145_v44, %v131_v43 }
  0x2b   :  { %v147_v47 = vadd.f32 %v146_v46, %v132_v45 }
  0x2d   :  { %148 = vadd.xlane.f32.xlu0 %v147_v47 }
  0xa0   :  { %v149_v49 = vpop.xlane.xlu0 %148 }
  0xa1   :  { %v150_v50 = vadd.f32 %v149_v49, %v101_v48 }
  0xa3   :  { %152 = vst.msk [vmem:[#allocation2] sm:$0xff] %vm67_vm0, %v150_v50 }
  0xaa   :  { %v156_v51 = vld [vmem:[#allocation2] sm:$0xff] }
  0xab   :  { %v157_v52 = vmul.f32 0.0009765625, %v156_v51 }
  0xad   :  { %158 = vst.msk [vmem:[#allocation7] sm:$0xff] %vm67_vm0, %v157_v52 }
  0xb4   :  { %v177_v53 = vld [vmem:[#allocation7] sm:$0x3] }
  0xb5   :  { %178 = vst [vmem:[%s297_s2] sm:$0x3] %v177_v53 }
  0xb6   :  { %196 = vsyncpa [#allocation4], 1 }
  0xb7   :  { %197 = vsyncpa [#allocation6], 1 }

</bundles_post_ra>
